<compile_context>
chip_gen: v6e
topology: v6e:2x2x1
jax: 0.10.0
libtpu: 0.0.40
codegen_flags: <defaults>
</compile_context>

<pallas_src>
import jax
import jax.numpy as jnp
import numpy as np
from jax.experimental import pallas as pl
from jax.experimental.pallas import tpu as pltpu


def _bilinear_matrix(in_size: int, out_size: int) -> jnp.ndarray:
    """Interpolation matrix U (out, in) matching F.interpolate(mode='bilinear',
    align_corners=False): src = (dst + 0.5) * in/out - 0.5, clamped at 0."""
    dst = jnp.arange(out_size, dtype=jnp.float32)
    src = (dst + 0.5) * (in_size / out_size) - 0.5
    src = jnp.clip(src, 0.0, float(in_size - 1))
    i0 = jnp.floor(src).astype(jnp.int32)
    i1 = jnp.minimum(i0 + 1, in_size - 1)
    lam = src - i0.astype(jnp.float32)
    rows = jnp.arange(out_size)
    U = jnp.zeros((out_size, in_size), dtype=jnp.float32)
    U = U.at[rows, i0].add(1.0 - lam)
    U = U.at[rows, i1].add(lam)
    return U


def decoder_block_kernel(x_ref, w1_ref, b1_ref, uh_ref,
                         w2_ref, b2_ref, w3_ref, b3_ref, o_ref):
    # x_ref: (H, W*Cin) lane-dense slab for one batch image.
    x = x_ref[...]

    # conv1 + folded-BN + ReLU  (block-diagonal weight over W).
    h1 = jnp.dot(x, w1_ref[...], preferred_element_type=jnp.float32)
    h1 = jnp.maximum(h1 + b1_ref[...], 0.0)                            # (H, W*C4)

    # bilinear x2 upsample, H direction: plain left-matmul, no relayout.
    t = jnp.dot(uh_ref[...], h1, preferred_element_type=jnp.float32)   # (H2, W*C4)

    # W-direction upsample fused with conv2 weight, + folded-BN + ReLU.
    h2 = jnp.dot(t, w2_ref[...], preferred_element_type=jnp.float32)
    h2 = jnp.maximum(h2 + b2_ref[...], 0.0)                            # (H2, W2*C4)

    # conv3 + folded-BN + ReLU.
    h3 = jnp.dot(h2, w3_ref[...], preferred_element_type=jnp.float32)
    h3 = jnp.maximum(h3 + b3_ref[...], 0.0)                            # (H2, W2*Cout)

    o_ref[...] = h3.astype(o_ref.dtype)                                # lane-dense store


def decoder_block(x, w1, s1, b1, w2, s2, b2, w3, s3, b3):
    """x: (N, H, W, Cin) float32, NHWC.  Returns (N, 2H, 2W, Cout)."""
    N, H, W, Cin = x.shape
    C4 = w1.shape[1]
    Cout = w3.shape[1]
    H2, W2 = 2 * H, 2 * W

    # ---- host-side parameter preparation (exact reformulation) ----
    # Fold BN scale into the 1x1-conv weights.
    w1f = w1 * s1.reshape(1, C4)
    w2f = w2 * s2.reshape(1, C4)
    w3f = w3 * s3.reshape(1, Cout)

    Uh = _bilinear_matrix(H, H2)                      # (H2, H)
    Uw = _bilinear_matrix(W, W2)                      # (W2, W)

    # Block-diagonal (per-W-column) 1x1 conv weights on the lane-dense slab.
    W1b = jnp.kron(jnp.eye(W, dtype=jnp.float32), w1f)    # (W*Cin, W*C4)
    # W-direction upsample fused with conv2:
    #   kron(Uw.T, I_C4) @ kron(I_W2, w2f) == kron(Uw.T, w2f)
    W2b = jnp.kron(Uw.T, w2f)                              # (W*C4, W2*C4)
    W3b = jnp.kron(jnp.eye(W2, dtype=jnp.float32), w3f)    # (W2*C4, W2*Cout)

    b1t = jnp.tile(b1.reshape(1, C4), (1, W))         # (1, W*C4)
    b2t = jnp.tile(b2.reshape(1, C4), (1, W2))        # (1, W2*C4)
    b3t = jnp.tile(b3.reshape(1, Cout), (1, W2))      # (1, W2*Cout)

    # Free layout change (same memory order): lane-dense in / lane-dense out.
    x_d = x.reshape(N, H, W * Cin)

    full = lambda shape: pl.BlockSpec(shape, lambda n: (0,) * len(shape))

    out = pl.pallas_call(
        decoder_block_kernel,
        out_shape=jax.ShapeDtypeStruct((N, H2, W2 * Cout), jnp.float32),
        grid_spec=pltpu.PrefetchScalarGridSpec(
            num_scalar_prefetch=0,
            grid=(N,),
            in_specs=[
                pl.BlockSpec((pl.Squeezed(), H, W * Cin),
                             lambda n: (n, 0, 0)),
                full(W1b.shape), full(b1t.shape),
                full(Uh.shape),
                full(W2b.shape), full(b2t.shape),
                full(W3b.shape), full(b3t.shape),
            ],
            out_specs=pl.BlockSpec((pl.Squeezed(), H2, W2 * Cout),
                                   lambda n: (n, 0, 0)),
        ),
        compiler_params=pltpu.CompilerParams(
            dimension_semantics=("parallel",)),
    )(x_d, W1b, b1t, Uh, W2b, b2t, W3b, b3t)

    return out.reshape(N, H2, W2, Cout)


def decoder_block_ref(x, w1, s1, b1, w2, s2, b2, w3, s3, b3):
    """Pure-JAX reference (same NHWC layout, un-fused formulation)."""
    H, W = x.shape[1], x.shape[2]
    Uh = _bilinear_matrix(H, 2 * H)
    Uw = _bilinear_matrix(W, 2 * W)
    h1 = jnp.maximum(jnp.einsum('nhwc,cd->nhwd', x, w1) * s1 + b1, 0.0)
    t = jnp.einsum('Hh,nhwc->nHwc', Uh, h1)
    up = jnp.einsum('Ww,nhwc->nhWc', Uw, t)
    h2 = jnp.maximum(jnp.einsum('nhwc,cd->nhwd', up, w2) * s2 + b2, 0.0)
    h3 = jnp.maximum(jnp.einsum('nhwc,cd->nhwd', h2, w3) * s3 + b3, 0.0)
    return h3


def _conv_bn_params(key, cin, cout):
    k1, k2, k3, k4, k5 = jax.random.split(key, 5)
    w = 0.1 * jax.random.normal(k1, (cin, cout), jnp.float32)
    gamma = 1.0 + 0.1 * jax.random.normal(k2, (cout,), jnp.float32)
    beta = 0.1 * jax.random.normal(k3, (cout,), jnp.float32)
    mean = 0.1 * jax.random.normal(k4, (cout,), jnp.float32)
    var = jnp.abs(jax.random.normal(k5, (cout,), jnp.float32)) + 0.5
    scale = gamma / jnp.sqrt(var + 1e-5)   # folded BN (inference mode)
    bias = beta - mean * scale
    return w, scale.reshape(1, cout), bias.reshape(1, cout)


if __name__ == "__main__":
    # Small shapes consistent with the module: in_channels=16 (-> 16//4 = 4),
    # out_channels=8, batch=2, spatial 16x16  ==>  output (2, 32, 32, 8).
    N, H, W = 2, 16, 16
    Cin, Cout = 16, 8
    C4 = Cin // 4

    key = jax.random.PRNGKey(0)
    kx, k1, k2, k3 = jax.random.split(key, 4)
    x = jax.random.normal(kx, (N, H, W, Cin), jnp.float32)

    w1, s1, b1 = _conv_bn_params(k1, Cin, C4)
    w2, s2, b2 = _conv_bn_params(k2, C4, C4)
    w3, s3, b3 = _conv_bn_params(k3, C4, Cout)

    out = decoder_block(x, w1, s1, b1, w2, s2, b2, w3, s3, b3)
    out = jax.block_until_ready(out)

    ref = decoder_block_ref(x, w1, s1, b1, w2, s2, b2, w3, s3, b3)
    ref = jax.block_until_ready(ref)

    assert out.shape == (N, 2 * H, 2 * W, Cout), out.shape
    np.testing.assert_allclose(np.asarray(out), np.asarray(ref),
                               rtol=1e-4, atol=1e-4)
    print("KERNEL_OK")
</pallas_src>

<mosaic_0001>
module attributes {stable_mosaic.version = 11 : i64} {
  func.func @decoder_block_kernel(%arg0: i32, %arg1: memref<1x16x256xf32, #tpu.memory_space<vmem>>, %arg2: memref<256x64xf32, #tpu.memory_space<vmem>>, %arg3: memref<1x64xf32, #tpu.memory_space<vmem>>, %arg4: memref<32x16xf32, #tpu.memory_space<vmem>>, %arg5: memref<64x128xf32, #tpu.memory_space<vmem>>, %arg6: memref<1x128xf32, #tpu.memory_space<vmem>>, %arg7: memref<128x256xf32, #tpu.memory_space<vmem>>, %arg8: memref<1x256xf32, #tpu.memory_space<vmem>>, %arg9: memref<1x32x256xf32, #tpu.memory_space<vmem>>) attributes {dimension_semantics = [#tpu.dimension_semantics<parallel>], iteration_bounds = array<i64: 2>, scalar_prefetch = 0 : i64, scratch_operands = 0 : i64, tpu.core_type = #tpu.core_type<tc>, window_params = [{transform_indices = @transform_0, window_bounds = array<i64: 1, 16, 256>}, {pipeline_mode = #tpu.pipeline_mode<synchronous>, transform_indices = @transform_1, window_bounds = array<i64: 256, 64>}, {pipeline_mode = #tpu.pipeline_mode<synchronous>, transform_indices = @transform_2, window_bounds = array<i64: 1, 64>}, {pipeline_mode = #tpu.pipeline_mode<synchronous>, transform_indices = @transform_3, window_bounds = array<i64: 32, 16>}, {pipeline_mode = #tpu.pipeline_mode<synchronous>, transform_indices = @transform_4, window_bounds = array<i64: 64, 128>}, {pipeline_mode = #tpu.pipeline_mode<synchronous>, transform_indices = @transform_5, window_bounds = array<i64: 1, 128>}, {pipeline_mode = #tpu.pipeline_mode<synchronous>, transform_indices = @transform_6, window_bounds = array<i64: 128, 256>}, {pipeline_mode = #tpu.pipeline_mode<synchronous>, transform_indices = @transform_7, window_bounds = array<i64: 1, 256>}, {transform_indices = @transform_8, window_bounds = array<i64: 1, 32, 256>}]} {
    %c0 = arith.constant 0 : index
    %c0_0 = arith.constant 0 : index
    %c0_1 = arith.constant 0 : index
    %0 = vector.load %arg1[%c0, %c0_0, %c0_1] : memref<1x16x256xf32, #tpu.memory_space<vmem>>, vector<1x16x256xf32>
    %1 = vector.shape_cast %0 : vector<1x16x256xf32> to vector<16x256xf32>
    %c0_2 = arith.constant 0 : index
    %c0_3 = arith.constant 0 : index
    %2 = vector.load %arg2[%c0_2, %c0_3] : memref<256x64xf32, #tpu.memory_space<vmem>>, vector<256x64xf32>
    %cst = arith.constant dense<0.000000e+00> : vector<16x64xf32>
    %3 = tpu.matmul %1, %2, %cst {dimension_numbers = #tpu.dot_dimension_numbers<[1], [0], [0], [1], [0, 0, 1, 1], [], []>} : vector<16x256xf32>, vector<256x64xf32>, vector<16x64xf32> -> vector<16x64xf32>
    %c0_4 = arith.constant 0 : index
    %c0_5 = arith.constant 0 : index
    %4 = vector.load %arg3[%c0_4, %c0_5] : memref<1x64xf32, #tpu.memory_space<vmem>>, vector<1x64xf32>
    %5 = vector.broadcast %4 : vector<1x64xf32> to vector<16x64xf32>
    %6 = arith.addf %3, %5 : vector<16x64xf32>
    %cst_6 = arith.constant 0.000000e+00 : f32
    %7 = vector.broadcast %cst_6 : f32 to vector<16x64xf32>
    %8 = arith.maximumf %6, %7 : vector<16x64xf32>
    %c0_7 = arith.constant 0 : index
    %c0_8 = arith.constant 0 : index
    %9 = vector.load %arg4[%c0_7, %c0_8] : memref<32x16xf32, #tpu.memory_space<vmem>>, vector<32x16xf32>
    %cst_9 = arith.constant dense<0.000000e+00> : vector<32x64xf32>
    %10 = tpu.matmul %9, %8, %cst_9 {dimension_numbers = #tpu.dot_dimension_numbers<[1], [0], [0], [1], [0, 0, 1, 1], [], []>} : vector<32x16xf32>, vector<16x64xf32>, vector<32x64xf32> -> vector<32x64xf32>
    %c0_10 = arith.constant 0 : index
    %c0_11 = arith.constant 0 : index
    %11 = vector.load %arg5[%c0_10, %c0_11] : memref<64x128xf32, #tpu.memory_space<vmem>>, vector<64x128xf32>
    %cst_12 = arith.constant dense<0.000000e+00> : vector<32x128xf32>
    %12 = tpu.matmul %10, %11, %cst_12 {dimension_numbers = #tpu.dot_dimension_numbers<[1], [0], [0], [1], [0, 0, 1, 1], [], []>} : vector<32x64xf32>, vector<64x128xf32>, vector<32x128xf32> -> vector<32x128xf32>
    %c0_13 = arith.constant 0 : index
    %c0_14 = arith.constant 0 : index
    %13 = vector.load %arg6[%c0_13, %c0_14] : memref<1x128xf32, #tpu.memory_space<vmem>>, vector<1x128xf32>
    %14 = vector.broadcast %13 : vector<1x128xf32> to vector<32x128xf32>
    %15 = arith.addf %12, %14 : vector<32x128xf32>
    %cst_15 = arith.constant 0.000000e+00 : f32
    %16 = vector.broadcast %cst_15 : f32 to vector<32x128xf32>
    %17 = arith.maximumf %15, %16 : vector<32x128xf32>
    %c0_16 = arith.constant 0 : index
    %c0_17 = arith.constant 0 : index
    %18 = vector.load %arg7[%c0_16, %c0_17] : memref<128x256xf32, #tpu.memory_space<vmem>>, vector<128x256xf32>
    %cst_18 = arith.constant dense<0.000000e+00> : vector<32x256xf32>
    %19 = tpu.matmul %17, %18, %cst_18 {dimension_numbers = #tpu.dot_dimension_numbers<[1], [0], [0], [1], [0, 0, 1, 1], [], []>} : vector<32x128xf32>, vector<128x256xf32>, vector<32x256xf32> -> vector<32x256xf32>
    %c0_19 = arith.constant 0 : index
    %c0_20 = arith.constant 0 : index
    %20 = vector.load %arg8[%c0_19, %c0_20] : memref<1x256xf32, #tpu.memory_space<vmem>>, vector<1x256xf32>
    %21 = vector.broadcast %20 : vector<1x256xf32> to vector<32x256xf32>
    %22 = arith.addf %19, %21 : vector<32x256xf32>
    %cst_21 = arith.constant 0.000000e+00 : f32
    %23 = vector.broadcast %cst_21 : f32 to vector<32x256xf32>
    %24 = arith.maximumf %22, %23 : vector<32x256xf32>
    %c0_22 = arith.constant 0 : index
    %c0_23 = arith.constant 0 : index
    %c0_24 = arith.constant 0 : index
    %25 = vector.load %arg9[%c0_22, %c0_23, %c0_24] : memref<1x32x256xf32, #tpu.memory_space<vmem>>, vector<1x32x256xf32>
    %26 = vector.shape_cast %25 : vector<1x32x256xf32> to vector<32x256xf32>
    %27 = vector.shape_cast %24 : vector<32x256xf32> to vector<1x32x256xf32>
    tpu.vector_store %arg9[%c0_22, %c0_23, %c0_24], %27 {strides = array<i32>} : memref<1x32x256xf32, #tpu.memory_space<vmem>>, vector<1x32x256xf32>,
    return
  }
  func.func @transform_0(%arg0: i32) -> (i32, i32, i32) {
    %c0_i32 = arith.constant 0 : i32
    %c0_i32_0 = arith.constant 0 : i32
    %c0_i32_1 = arith.constant 0 : i32
    return %arg0, %c0_i32, %c0_i32_0 : i32, i32, i32
  }
  func.func @transform_1(%arg0: i32) -> (i32, i32) {
    %c0_i32 = arith.constant 0 : i32
    %c0_i32_0 = arith.constant 0 : i32
    %c0_i32_1 = arith.constant 0 : i32
    return %c0_i32, %c0_i32_0 : i32, i32
  }
  func.func @transform_2(%arg0: i32) -> (i32, i32) {
    %c0_i32 = arith.constant 0 : i32
    %c0_i32_0 = arith.constant 0 : i32
    %c0_i32_1 = arith.constant 0 : i32
    return %c0_i32, %c0_i32_0 : i32, i32
  }
  func.func @transform_3(%arg0: i32) -> (i32, i32) {
    %c0_i32 = arith.constant 0 : i32
    %c0_i32_0 = arith.constant 0 : i32
    %c0_i32_1 = arith.constant 0 : i32
    return %c0_i32, %c0_i32_0 : i32, i32
  }
  func.func @transform_4(%arg0: i32) -> (i32, i32) {
    %c0_i32 = arith.constant 0 : i32
    %c0_i32_0 = arith.constant 0 : i32
    %c0_i32_1 = arith.constant 0 : i32
    return %c0_i32, %c0_i32_0 : i32, i32
  }
  func.func @transform_5(%arg0: i32) -> (i32, i32) {
    %c0_i32 = arith.constant 0 : i32
    %c0_i32_0 = arith.constant 0 : i32
    %c0_i32_1 = arith.constant 0 : i32
    return %c0_i32, %c0_i32_0 : i32, i32
  }
  func.func @transform_6(%arg0: i32) -> (i32, i32) {
    %c0_i32 = arith.constant 0 : i32
    %c0_i32_0 = arith.constant 0 : i32
    %c0_i32_1 = arith.constant 0 : i32
    return %c0_i32, %c0_i32_0 : i32, i32
  }
  func.func @transform_7(%arg0: i32) -> (i32, i32) {
    %c0_i32 = arith.constant 0 : i32
    %c0_i32_0 = arith.constant 0 : i32
    %c0_i32_1 = arith.constant 0 : i32
    return %c0_i32, %c0_i32_0 : i32, i32
  }
  func.func @transform_8(%arg0: i32) -> (i32, i32, i32) {
    %c0_i32 = arith.constant 0 : i32
    %c0_i32_0 = arith.constant 0 : i32
    %c0_i32_1 = arith.constant 0 : i32
    return %arg0, %c0_i32, %c0_i32_0 : i32, i32, i32
  }
}

</mosaic_0001>

<bundles_post_ra>
// kernel: tpu_custom_call.1
= control target key start
LH: loop header
LB: loop body
LE: loop exit
PB: predicated region body
PF: predicated region fallthrough
CT: control target
= control target key end

     0   :  { %13 = vsyncpa [#allocation3], 0  ;;  %s1486_s0 = inlined_call_operand.vmem [shape: f32[2,16,256], index: 0, kind: input, shape index: {}]   ;;  %s1487_s1 = inlined_call_operand.vmem [shape: f32[256,64], index: 1, kind: input, shape index: {}]   ;;  %s1488_s2 = inlined_call_operand.vmem [shape: f32[1,64], index: 2, kind: input, shape index: {}]   ;;  %s1489_s3 = inlined_call_operand.vmem [shape: f32[32,16], index: 3, kind: input, shape index: {}]   ;;  %s1490_s4 = inlined_call_operand.vmem [shape: f32[64,128], index: 4, kind: input, shape index: {}]   ;;  %s1491_s5 = inlined_call_operand.vmem [shape: f32[1,128], index: 5, kind: input, shape index: {}]   ;;  %s1492_s6 = inlined_call_operand.vmem [shape: f32[128,256], index: 6, kind: input, shape index: {}]   ;;  %s1493_s7 = inlined_call_operand.vmem [shape: f32[1,256], index: 7, kind: input, shape index: {}]   ;;  %s1494_s8 = inlined_call_operand.hbm [shape: f32[2,32,256], index: 8, kind: output, shape index: {}]  }
   0x1   :  { %15 = vsyncpa [#allocation3 + $0x1], 0  ;;  %s1133_s27 = smov 0   ;;  %s1135_s28 = smov 0  }
   0x2   :  { %s1137_s29 = smov 0   ;;  %s1139_s30 = smov 0  }
   0x3 LB: > { %s1154_s9 = sadd.s32 4294967295, %s1082_s30   ;;  %s868_s10 = sadd.s32 4294967294, %s1082_s30   ;;  %s1082_s30 = sphi %s1139_s30, %s1500_s30   ;;  %s1078_s29 = sphi %s1137_s29, %s1499_s29   ;;  %s1074_s28 = sphi %s1135_s28, %s1498_s28   ;;  %s1070_s27 = sphi %s1133_s27, %s1497_s27  }
   0x4   : > { %s1158_s11 = sadd.s32 1, %s1082_s30   ;;  %s201_s12 = sadd.s32 1, %s1078_s29 }
   0x5   : > { %s198_s13 = ssub.s32 %s1082_s30, %s1158_s11  ;;  %p211_p0 = scmp.ne.s32.totalorder %s1078_s29, %s1074_s28 }
   0x6   : > { %p199_p1 = scmp.eq.s32.totalorder %s198_s13, 0  ;;  %p212_p2 = scmp.eq.s32.totalorder %s1154_s9, 1 }
   0x7   : > { %p217_p3 = scmp.ne.s32.totalorder %s1074_s28, %s1070_s27  ;;  %p218_p4 = scmp.eq.s32.totalorder %s868_s10, 1 }
   0x8   : > { %s1169_s14 = scalar_select %p199_p1, %s1078_s29, %s201_s12  }
   0x9   : > { %p1171_p5 = por %p212_p2, %p211_p0  ;;  %p1175_p6 = por %p218_p4, %p217_p3 }
   0xa   : > { %p871_p7 = scmp.ge.s32.totalorder %s1082_s30, 1  ;;  %p265_p8 = scmp.lt.s32.totalorder %s1082_s30, 3 }
   0xc   : > { %p266_p9 = pnand %p871_p7, %p265_p8 }
   0xd   : > { %p299_p10 = scmp.lt.s32.totalorder (!%p266_p9), %s1154_s9, 1  ;;  %s296_s12 = sand.u32 (!%p266_p9), 1, %s1074_s28  }
   0xe   : > { %269 = sbr.rel (%p266_p9) target bundleno = 881 (0x371), region = 52  ;;  %s891_s18 = sshll.u32 (!%p266_p9), %s1154_s9, 10 }
   0xf   : > { %s1440_s22 = scalar_lea.hbm (!%p266_p9), %s1494_s8, %s891_s18  ;;  %s1085_s23 = smov (!%p266_p9), [#allocation2]  }
  0x10   : > { %s1026_s24 = sshll.u32 (!%p266_p9), %s1085_s23, 4  ;;  %s1027_s24 = int_to_ptr.vmem [resolvable:$false] %s1026_s24 }
  0x11   : > { %s1028_s25 = scalar_lea.vmem (!%p266_p9), %s1027_s24, 2048 }
  0x13   : > { %v339_v0 = vld [vmem:[%s1487_s1 + $0xf8] sm:$0xff]  ;;  %v338_v2 = vld [vmem:[%s1487_s1 + $0xf0] sm:$0xff]  ;;  %v337_v4 = vld [vmem:[%s1487_s1 + $0xe8] sm:$0xff]  ;;  %s300_s10 = scalar_select %p299_p10, %s1154_s9, 1  ;;  %vm428_vm0 = vcmask 130048   ;;  %vm541_vm1 = vcmask 523264  }
  0x14   : > { %v323_v1 = vld [vmem:[%s1487_s1 + $0x78] sm:$0xff]  ;;  %892 = vmatprep.subr.mxu0 %v339_v0  ;;  %v322_v3 = vld [vmem:[%s1487_s1 + $0x70] sm:$0xff]  ;;  %v321_v5 = vld [vmem:[%s1487_s1 + $0x68] sm:$0xff]  ;;  %s1446_s9 = scalar_lea.sflag [#allocation3], %s296_s12 }
  0x15   : > { %893 = vmatpush3.msra.mxu0 %v323_v1  ;;  %v336_v6 = vld [vmem:[%s1487_s1 + $0xe0] sm:$0xff]  ;;  %s890_s19 = sshll.u32 %s300_s10, 5  ;;  %v335_v8 = vld [vmem:[%s1487_s1 + $0xd8] sm:$0xff]  ;;  %v334_v10 = vld [vmem:[%s1487_s1 + $0xd0] sm:$0xff]  ;;  %s872_s10 = sshll.u32 %s296_s12, 6 }
  0x16   : > { %894 = vmatprep.subr.mxu0 %v338_v2  ;;  %v320_v7 = vld [vmem:[%s1487_s1 + $0x60] sm:$0xff]  ;;  %v319_v9 = vld [vmem:[%s1487_s1 + $0x58] sm:$0xff]  ;;  %s1216_s13 = scalar_lea.vmem %s1486_s0, %s890_s19  ;;  %v318_v11 = vld [vmem:[%s1487_s1 + $0x50] sm:$0xff]  ;;  %s298_s17 = scalar_lea.vmem [#allocation2], %s872_s10 }
  0x17   : > { %895 = vmatpush3.msra.mxu0 %v322_v3  ;;  %v333_v12 = vld [vmem:[%s1487_s1 + $0xc8] sm:$0xff]  ;;  %v332_v15 = vld [vmem:[%s1487_s1 + $0xc0] sm:$0xff]  ;;  %v331_v17 = vld [vmem:[%s1487_s1 + $0xb8] sm:$0xff] }
  0x18   : > { %896 = vmatprep.subr.mxu0 %v337_v4  ;;  %v305_v13 = vld [vmem:[%s1216_s13 + $0x8] sm:$0xff]  ;;  %v316_v16 = vld [vmem:[%s1487_s1 + $0x40] sm:$0xff]  ;;  %v315_v18 = vld [vmem:[%s1487_s1 + $0x38] sm:$0xff] }
  0x19   : > { %897 = vmatpush3.msra.mxu0 %v321_v5  ;;  %v317_v14 = vld [vmem:[%s1487_s1 + $0x48] sm:$0xff]  ;;  %411 = vmatprep.mubr.f32.mxu0 %v305_v13  ;;  %v330_v19 = vld [vmem:[%s1487_s1 + $0xb0] sm:$0xff]  ;;  %v328_v23 = vld [vmem:[%s1487_s1 + $0xa0] sm:$0xff] }
  0x1a   : > { %898 = vmatprep.subr.mxu0 %v336_v6  ;;  %v314_v20 = vld [vmem:[%s1487_s1 + $0x30] sm:$0xff]  ;;  %v329_v21 = vld [vmem:[%s1487_s1 + $0xa8] sm:$0xff]  ;;  %v312_v24 = vld [vmem:[%s1487_s1 + $0x20] sm:$0xff] }
  0x1b   : > { %899 = vmatpush3.msra.mxu0 %v320_v7  ;;  %v313_v22 = vld [vmem:[%s1487_s1 + $0x28] sm:$0xff]  ;;  %v327_v25 = vld [vmem:[%s1487_s1 + $0x98] sm:$0xff]  ;;  %v326_v27 = vld [vmem:[%s1487_s1 + $0x90] sm:$0xff] }
  0x1c   : > { %900 = vmatprep.subr.mxu0 %v335_v8  ;;  %v311_v26 = vld [vmem:[%s1487_s1 + $0x18] sm:$0xff]  ;;  %v310_v28 = vld [vmem:[%s1487_s1 + $0x10] sm:$0xff]  ;;  %v325_v29 = vld [vmem:[%s1487_s1 + $0x88] sm:$0xff] }
  0x1d   : > { %901 = vmatpush3.msra.mxu0 %v319_v9  ;;  %v309_v30 = vld [vmem:[%s1487_s1 + $0x8] sm:$0xff]  ;;  %v324_v31 = vld [vmem:[%s1487_s1 + $0x80] sm:$0xff]  ;;  %v307_v34 = vld [vmem:[%s1216_s13 + $0x18] sm:$0xff] }
  0x1e   : > { %902 = vmatprep.subr.mxu0 %v334_v10  ;;  %v308_v32 = vld [vmem:[%s1487_s1] sm:$0xff]  ;;  %v306_v35 = vld [vmem:[%s1216_s13 + $0x10] sm:$0xff]  ;;  %v533_v37 = vld [vmem:[%s1490_s4 + $0x38] sm:$0xff] }
  0x1f   : > { %903 = vmatpush3.msra.mxu0 %v318_v11  ;;  %v304_v33 = vld [vmem:[%s1216_s13] sm:$0xff]  ;;  %v532_v38 = vld [vmem:[%s1490_s4 + $0x30] sm:$0xff]  ;;  %v531_v39 = vld [vmem:[%s1490_s4 + $0x28] sm:$0xff]  ;;  %s806_s13 = sshll.u32 %s298_s17, 4  ;;  %s1442_s13 = int_to_ptr.vmem [resolvable:$true] %s806_s13 }
  0x20   : > { %904 = vmatprep.subr.mxu0 %v333_v12  ;;  %v424_v36 = vld [vmem:[%s1489_s3] sm:$0xff]  ;;  %v529_v41 = vld [vmem:[%s1490_s4 + $0x18] sm:$0xff]  ;;  %v528_v42 = vld [vmem:[%s1490_s4 + $0x10] sm:$0xff]  ;;  %s1022_s19 = scalar_lea.vmem %s1442_s13, 1024  ;;  %p1029_p0 = scmp.lt.s32.totalorder %s1442_s13, %s1027_s24 }
  0x21   : > { %905 = vmatpush3.msra.mxu0 %v317_v14  ;;  %952 = vmatprep.mubr.msk.f32.mxu1 %vm428_vm0, %v424_v36  ;;  %v530_v40 = vld [vmem:[%s1490_s4 + $0x20] sm:$0xff]  ;;  %v425_v54 = vld [vmem:[%s1489_s3 + $0x8] sm:$0xff]  ;;  %v426_v55 = vld [vmem:[%s1489_s3 + $0x10] sm:$0xff]  ;;  %p1023_p11 = scmp.ne.s32.totalorder %s1442_s13, %s1022_s19  ;;  %p1030_p1 = scmp.lt.s32.totalorder %s1028_s25, %s1022_s19 }
  0x22   : > { %906 = vmatprep.subr.mxu0 %v332_v15  ;;  %v875_v47 = vld [vmem:[%s1488_s2] ss:$0 sm:$0xff]  ;;  %v427_v56 = vld [vmem:[%s1489_s3 + $0x18] sm:$0xff]  ;;  %v527_v57 = vld [vmem:[%s1490_s4 + $0x8] sm:$0xff] }
  0x23   : > { %907 = vmatpush3.msra.mxu0 %v316_v16  ;;  %v526_v58 = vld [vmem:[%s1490_s4] sm:$0xff]  ;;  %v674_v59 = vld [vmem:[%s1492_s6 + $0xf8] sm:$0xff]  ;;  %v673_v60 = vld [vmem:[%s1492_s6 + $0xf0] sm:$0xff]  ;;  %p1024_p12 = pnand %p1023_p11, %p1171_p5  ;;  %p1031_p2 = por %p1030_p1, %p1029_p0 }
  0x24   : > { %908 = vmatprep.subr.mxu0 %v331_v17  ;;  %v672_v61 = vld [vmem:[%s1492_s6 + $0xe8] sm:$0xff]  ;;  %v671_v62 = vld [vmem:[%s1492_s6 + $0xe0] sm:$0xff]  ;;  %v670_v63 = vld [vmem:[%s1492_s6 + $0xd8] sm:$0xff] }
  0x25   : > { %909 = vmatpush3.msra.mxu0 %v315_v18  ;;  %v669_v0 = vld [vmem:[%s1492_s6 + $0xd0] sm:$0xff]  ;;  %v668_v1 = vld [vmem:[%s1492_s6 + $0xc8] sm:$0xff]  ;;  %v667_v2 = vld [vmem:[%s1492_s6 + $0xc0] sm:$0xff]  ;;  %p1025_p13 = pneg %p1024_p12 }
  0x26   : > { %910 = vmatprep.subr.mxu0 %v330_v19  ;;  %v666_v3 = vld [vmem:[%s1492_s6 + $0xb8] sm:$0xff]  ;;  %v665_v4 = vld [vmem:[%s1492_s6 + $0xb0] sm:$0xff]  ;;  %v664_v5 = vld [vmem:[%s1492_s6 + $0xa8] sm:$0xff] }
  0x27   : > { %911 = vmatpush3.msra.mxu0 %v314_v20  ;;  %v663_v6 = vld [vmem:[%s1492_s6 + $0xa0] sm:$0xff]  ;;  %v662_v7 = vld [vmem:[%s1492_s6 + $0x98] sm:$0xff]  ;;  %v661_v8 = vld [vmem:[%s1492_s6 + $0x90] sm:$0xff]  ;;  %p1032_p3 = pnand %p1031_p2, %p1025_p13 }
  0x28   : > { %912 = vmatprep.subr.mxu0 %v329_v21  ;;  %v660_v9 = vld [vmem:[%s1492_s6 + $0x88] sm:$0xff]  ;;  %v659_v10 = vld [vmem:[%s1492_s6 + $0x80] sm:$0xff]  ;;  %v658_v11 = vld [vmem:[%s1492_s6 + $0x78] sm:$0xff] }
  0x29   : > { %913 = vmatpush3.msra.mxu0 %v313_v22  ;;  %v657_v12 = vld [vmem:[%s1492_s6 + $0x70] sm:$0xff]  ;;  %v656_v13 = vld [vmem:[%s1492_s6 + $0x68] sm:$0xff]  ;;  %v655_v14 = vld [vmem:[%s1492_s6 + $0x60] sm:$0xff] }
  0x2a   : > { %914 = vmatprep.subr.mxu0 %v328_v23  ;;  %v654_v15 = vld [vmem:[%s1492_s6 + $0x58] sm:$0xff]  ;;  %v653_v16 = vld [vmem:[%s1492_s6 + $0x50] sm:$0xff]  ;;  %v652_v17 = vld [vmem:[%s1492_s6 + $0x48] sm:$0xff] }
  0x2b   : > { %915 = vmatpush3.msra.mxu0 %v312_v24  ;;  %v651_v18 = vld [vmem:[%s1492_s6 + $0x40] sm:$0xff]  ;;  %v650_v19 = vld [vmem:[%s1492_s6 + $0x38] sm:$0xff]  ;;  %v649_v24 = vld [vmem:[%s1492_s6 + $0x30] sm:$0xff] }
  0x2c   : > { %916 = vmatprep.subr.mxu0 %v327_v25  ;;  %v648_v25 = vld [vmem:[%s1492_s6 + $0x28] sm:$0xff] }
  0x2d   : > { %917 = vmatpush3.msra.mxu0 %v311_v26  ;;  %v647_v26 = vld [vmem:[%s1492_s6 + $0x20] sm:$0xff] }
  0x2e   : > { %918 = vmatprep.subr.mxu0 %v326_v27  ;;  %v646_v27 = vld [vmem:[%s1492_s6 + $0x18] sm:$0xff] }
  0x2f   : > { %919 = vmatpush3.msra.mxu0 %v310_v28  ;;  %v645_v28 = vld [vmem:[%s1492_s6 + $0x10] sm:$0xff] }
  0x30   : > { %920 = vmatprep.subr.mxu0 %v325_v29  ;;  %v644_v29 = vld [vmem:[%s1492_s6 + $0x8] sm:$0xff] }
  0x31   : > { %921 = vmatpush3.msra.mxu0 %v309_v30  ;;  %v643_v30 = vld [vmem:[%s1492_s6] sm:$0xff] }
  0x32   : > { %922 = vmatprep.subr.mxu0 %v324_v31  ;;  %v1084_v31 = vmov 0.0  }
  0x33   : > { %923 = vmatpush3.msra.mxu0 %v308_v32 }
  0x34   : > { %412 = vmatmul.mubr.f32.vlgmr.msra.gmra.mxu0 %v304_v33  ;;  %958 = vmatprep.subr.mxu0 %v533_v37  ;;  %v880_v33 = vld [vmem:[%s1491_s5] ss:$0 sm:$0xff] }
  0x35   : > { %416 = vmatprep.mubr.f32.mxu0 %v307_v34  ;;  %959 = vmatpush3.msra.mxu0 %v533_v37 }
  0x36   : > { %960 = vmatprep.subr.mxu0 %v532_v38 }
  0x37   : > { %961 = vmatpush3.msra.mxu0 %v532_v38 }
  0x38   : > { %417 = vmatmul.mubr.f32.gmra.mxu0 %v306_v35  ;;  %962 = vmatprep.subr.mxu0 %v531_v39 }
  0x39   : > { %963 = vmatpush3.msra.mxu0 %v531_v39 }
  0x3a   : > { %964 = vmatprep.subr.mxu0 %v530_v40 }
  0x3b   : > { %965 = vmatpush3.msra.mxu0 %v530_v40 }
  0x3c   : > { %966 = vmatprep.subr.mxu0 %v529_v41 }
  0x3d   : > { %967 = vmatpush3.msra.mxu0 %v529_v41 }
  0x3e   : > { %968 = vmatprep.subr.mxu0 %v528_v42 }
  0x3f   : > { %969 = vmatpush3.msra.mxu0 %v528_v42 }
  0x40   : > { %970 = vmatprep.subr.mxu0 %v527_v57 }
  0x41   : > { %971 = vmatpush3.msra.mxu0 %v527_v57 }
  0x42   : > { %972 = vmatprep.subr.mxu0 %v526_v58 }
  0x43   : > { %973 = vmatpush3.msra.mxu0 %v526_v58 }
  0xf4   : > { %v924_v43 = vpop.f32.mrf.mxu0 }
  0xf6   : > { %v925_v44 = vpop.f32.mrf.mxu0 }
  0xf7   : > { %v926_v46 = vadd.f32 %v925_v44, %v924_v43 }
  0xf8   : > { %v927_v45 = vpop.f32.mrf.mxu0 }
  0xf9   : > { %v414_v50 = vadd.f32 %v926_v46, %v875_v47 }
  0xfa   : > { %v928_v48 = vpop.f32.mrf.mxu0 }
  0xfb   : > { %v929_v49 = vadd.f32 %v928_v48, %v927_v45  ;;  %v422_v53 = vmax.f32 %v414_v50, 0.0  ;;  %v677_v45 = vlaneseq  ;;  %v675_v48 = vld [vmem:[%s1493_s7] sm:$0x3] }
  0xfd   : > { %v419_v51 = vadd.f32 %v929_v49, %v875_v47  ;;  %v678_v46 = vshrl.u32 %v677_v45, 7 }
  0xff   : > { %v423_v52 = vmax.f32 %v419_v51, 0.0  ;;  %v679_v47 = vsub.s32 0, %v678_v46  ;;  %v683_v49 = vsub.s32 1, %v678_v46 }
 0x101   : > { %948 = vmatprep.subr.mxu1 %v423_v52  ;;  %v680_v50 = vrot.slane %v675_v48, %v679_v47  ;;  %v684_v51 = vrot.slane %v675_v48, %v683_v49 }
 0x102   : > { %949 = vmatpush3.msra.mxu1 %v423_v52 }
 0x103   : > { %950 = vmatprep.subr.mxu1 %v422_v53 }
 0x104   : > { %951 = vmatpush3.msra.mxu1 %v422_v53 }
 0x105   : > { %953 = vmatmul.mubr.msk.f32.vlgmr.msra.gmra.mxu1 %vm428_vm0, %v425_v54  ;;  %687 = vmatprep.subr.mxu1 %v674_v59 }
 0x106   : > { %955 = vmatprep.mubr.msk.f32.mxu1 %vm428_vm0, %v426_v55  ;;  %688 = vmatpush1.msra.mxu1 %v673_v60 }
 0x107   : > { %689 = vmatprep.subr.mxu1 %v672_v61 }
 0x108   : > { %690 = vmatpush1.msra.mxu1 %v671_v62 }
 0x109   : > { %956 = vmatmul.mubr.msk.f32.gmra.mxu1 %vm428_vm0, %v427_v56  ;;  %691 = vmatprep.subr.mxu1 %v670_v63 }
 0x10a   : > { %692 = vmatpush1.msra.mxu1 %v669_v0  ;;  %751 = vmatprep.mubr.f32.mxu1 %v1084_v31 }
 0x10b   : > { %693 = vmatprep.subr.mxu1 %v668_v1 }
 0x10c   : > { %694 = vmatpush1.msra.mxu1 %v667_v2 }
 0x10d   : > { %695 = vmatprep.subr.mxu1 %v666_v3 }
 0x10e   : > { %696 = vmatpush1.msra.mxu1 %v665_v4 }
 0x10f   : > { %697 = vmatprep.subr.mxu1 %v664_v5 }
 0x110   : > { %698 = vmatpush1.msra.mxu1 %v663_v6 }
 0x111   : > { %699 = vmatprep.subr.mxu1 %v662_v7 }
 0x112   : > { %700 = vmatpush1.msra.mxu1 %v661_v8 }
 0x113   : > { %701 = vmatprep.subr.mxu1 %v660_v9 }
 0x114   : > { %702 = vmatpush1.msra.mxu1 %v659_v10 }
 0x115   : > { %703 = vmatprep.subr.mxu1 %v658_v11 }
 0x116   : > { %704 = vmatpush1.msra.mxu1 %v657_v12 }
 0x117   : > { %705 = vmatprep.subr.mxu1 %v656_v13 }
 0x118   : > { %706 = vmatpush1.msra.mxu1 %v655_v14 }
 0x119   : > { %707 = vmatprep.subr.mxu1 %v654_v15 }
 0x11a   : > { %708 = vmatpush1.msra.mxu1 %v653_v16 }
 0x11b   : > { %709 = vmatprep.subr.mxu1 %v652_v17 }
 0x11c   : > { %710 = vmatpush1.msra.mxu1 %v651_v18 }
 0x11d   : > { %711 = vmatprep.subr.mxu1 %v650_v19 }
 0x11e   : > { %712 = vmatpush1.msra.mxu1 %v649_v24 }
 0x11f   : > { %713 = vmatprep.subr.mxu1 %v648_v25 }
 0x120   : > { %714 = vmatpush1.msra.mxu1 %v647_v26 }
 0x121   : > { %715 = vmatprep.subr.mxu1 %v646_v27 }
 0x122   : > { %716 = vmatpush1.msra.mxu1 %v645_v28 }
 0x123   : > { %717 = vmatprep.subr.mxu1 %v644_v29 }
 0x124   : > { %718 = vmatpush1.msra.mxu1 %v643_v30 }
 0x1c5   : > { %v954_v20 = vpop.f32.mrf.mxu1 }
 0x1c7   : > { %v507_v21 = vpop.f32.mrf.mxu1 }
 0x1c8   : > { %974 = vmatprep.mubr.msk.f32.mxu0 %vm541_vm1, %v507_v21 }
 0x1c9   : > { %v957_v22 = vpop.f32.mrf.mxu1  ;;  %975 = vmatmul.mubr.msk.f32.vlgmr.msra.gmra.mxu0 %vm541_vm1, %v954_v20 }
 0x1cb   : > { %v517_v23 = vpop.f32.mrf.mxu1 }
 0x1cc   : > { %977 = vmatprep.mubr.msk.f32.mxu0 %vm541_vm1, %v517_v23 }
 0x1cd   : > { %978 = vmatmul.mubr.msk.f32.gmra.mxu0 %vm541_vm1, %v957_v22 }
 0x289   : > { %v976_v32 = vpop.f32.mrf.mxu0 }
 0x28a   : > { %v626_v37 = vadd.f32 %v976_v32, %v880_v33 }
 0x28b   : > { %v620_v34 = vpop.f32.mrf.mxu0 }
 0x28c   : > { %v621_v35 = vadd.f32 %v880_v33, %v620_v34  ;;  %v640_v40 = vmax.f32 %v626_v37, 0.0 }
 0x28d   : > { %v979_v36 = vpop.f32.mrf.mxu0 }
 0x28e   : > { %v639_v38 = vmax.f32 %v621_v35, 0.0  ;;  %v636_v42 = vadd.f32 %v979_v36, %v880_v33 }
 0x28f   : > { %v630_v39 = vpop.f32.mrf.mxu0 }
 0x290   : > { %752 = vmatmul.mubr.f32.vlgmr.msra.gmra.mxu1 %v639_v38  ;;  %v631_v41 = vadd.f32 %v880_v33, %v630_v39  ;;  %v642_v44 = vmax.f32 %v636_v42, 0.0 }
 0x291   : > { %757 = vmatprep.mubr.f32.mxu1 %v1084_v31 }
 0x292   : > { %v641_v43 = vmax.f32 %v631_v41, 0.0 }
 0x294   : > { %758 = vmatmul.mubr.f32.gmra.mxu1 %v640_v40 }
 0x295   : > { %763 = vmatprep.mubr.f32.mxu1 %v1084_v31 }
 0x298   : > { %764 = vmatmul.mubr.f32.gmra.mxu1 %v641_v43 }
 0x299   : > { %769 = vmatprep.mubr.f32.mxu1 %v1084_v31 }
 0x29c   : > { %770 = vmatmul.mubr.f32.gmra.mxu1 %v642_v44 }
 0x350   : > { %v753_v52 = vpop.f32.mrf.mxu1 }
 0x351   : > { %v754_v53 = vadd.f32 %v753_v52, %v680_v50 }
 0x352   : > { %v755_v54 = vpop.f32.mrf.mxu1 }
 0x353   : > { %v776_v55 = vmax.f32 %v754_v53, 0.0  ;;  %v756_v56 = vadd.f32 %v755_v54, %v684_v51 }
 0x354   : > { %v759_v57 = vpop.f32.mrf.mxu1 }
 0x355   : > { %784 = vst [vmem:[%s298_s17] sm:$0xff] %v776_v55  ;;  %v777_v58 = vmax.f32 %v756_v56, 0.0  ;;  %v760_v59 = vadd.f32 %v759_v57, %v680_v50 }
 0x356   : > { %v761_v60 = vpop.f32.mrf.mxu1 }
 0x357   : > { %785 = vst [vmem:[%s298_s17 + $0x8] sm:$0xff] %v777_v58  ;;  %v778_v61 = vmax.f32 %v760_v59, 0.0  ;;  %v762_v62 = vadd.f32 %v761_v60, %v684_v51 }
 0x358   : > { %v765_v63 = vpop.f32.mrf.mxu1 }
 0x359   : > { %786 = vst [vmem:[%s298_s17 + $0x10] sm:$0xff] %v778_v61  ;;  %v779_v0 = vmax.f32 %v762_v62, 0.0  ;;  %v766_v1 = vadd.f32 %v765_v63, %v680_v50 }
 0x35a   : > { %v767_v2 = vpop.f32.mrf.mxu1 }
 0x35b   : > { %787 = vst [vmem:[%s298_s17 + $0x18] sm:$0xff] %v779_v0  ;;  %v780_v3 = vmax.f32 %v766_v1, 0.0  ;;  %v768_v4 = vadd.f32 %v767_v2, %v684_v51 }
 0x35c   : > { %v771_v5 = vpop.f32.mrf.mxu1 }
 0x35d   : > { %788 = vst [vmem:[%s298_s17 + $0x20] sm:$0xff] %v780_v3  ;;  %v781_v6 = vmax.f32 %v768_v4, 0.0  ;;  %v772_v7 = vadd.f32 %v771_v5, %v680_v50 }
 0x35e   : > { %v773_v8 = vpop.f32.mrf.mxu1 }
 0x35f   : > { %789 = vst [vmem:[%s298_s17 + $0x28] sm:$0xff] %v781_v6  ;;  %v782_v9 = vmax.f32 %v772_v7, 0.0  ;;  %v774_v10 = vadd.f32 %v773_v8, %v684_v51 }
 0x361   : > { %790 = vst [vmem:[%s298_s17 + $0x30] sm:$0xff] %v782_v9  ;;  %v783_v11 = vmax.f32 %v774_v10, 0.0 }
 0x363   : > { %791 = vst [vmem:[%s298_s17 + $0x38] sm:$0xff] %v783_v11 }
 0x364   : > { %1035 = shalt.err (!%p1032_p3)
}
 0x365   : > { %s1036_s26 = scalar_lea.hbm %s1440_s22, 1024  ;;  %s1040_s17 = scalar_lea.hbm %s1494_s8, 2048 }
 0x366   : > { %p1037_p4 = scmp.ne.s32.totalorder %s1440_s22, %s1036_s26  ;;  %p1041_p9 = scmp.lt.s32.totalorder %s1440_s22, %s1494_s8 }
 0x367   : > { %p1042_p10 = scmp.lt.s32.totalorder %s1040_s17, %s1036_s26 }
 0x368   : > { %p1038_p7 = pnand %p1037_p4, %p1171_p5 }
 0x369   : > { %p1043_p11 = por %p1042_p10, %p1041_p9 }
 0x36a   : > { %p1039_p8 = pneg %p1038_p7 }
 0x36c   : > { %p1044_p12 = pnand %p1043_p11, %p1039_p8 }
 0x36e   : > { %1047 = shalt.err (!%p1044_p12)
}
 0x36f   : > { %s1086_s21 = smov 256   ;;  %s1087_s19 = smov 16  }
 0x370   : > { %980 = dma.vmem_to_hbm [thread:$0]  (%p1171_p5), %s1442_s13, 1024, %s1440_s22, %s1446_s9, %s1086_s21, %s1086_s21, %s1087_s19  }
 0x371 PF: > { %p986_p13 = scmp.ge.s32.totalorder %s1082_s30, 2  ;;  %s821_s23 = sand.u32 1, %s1070_s27  }
 0x372   : > { %s822_s24 = scalar_lea.sflag [#allocation3], %s821_s23 }
 0x373   : > { %p983_p0 = pnand %p986_p13, %p1175_p6 }
 0x375   : > { %p984_p1 = pneg %p983_p0 }
 0x377   : > { %1065 = dma.done.wait (%p984_p1), %s822_s24, 1024  }
 0x378   : > { %1067 = vsyncadd (%p984_p1), %s822_s24, 4294966272  ;;  %p18_p2 = scmp.ge.s32.totalorder %s1158_s11, 4   ;;  %s1497_s27 = smov %s1074_s28 }
 0x379   : > { %s1498_s28 = smov %s1078_s29  ;;  %s1499_s29 = smov %s1169_s14 }
 0x37a   : > { %s1500_s30 = smov %s1158_s11  ;;  %20 = sbr.rel (!%p18_p2) target bundleno = 3 (0x3), region = 87 }
 0x37f   :  { %827 = vsyncpa [#allocation3], 1 }
 0x380   :  { %829 = vsyncpa [#allocation3 + $0x1], 1 }

</bundles_post_ra>
